<compile_context>
chip_gen: v7x
topology: tpu7x:2x2x1
jax: 0.10.0
libtpu: 0.0.40
codegen_flags: <defaults>
</compile_context>

<pallas_src>
import functools

import numpy as np
import jax
import jax.numpy as jnp
from jax import lax
from jax.experimental import pallas as pl
from jax.experimental.pallas import tpu as pltpu


def _phase_mask_kernel(re_ref, ret_ref, out_ref, *, threshold_factor, causal):
    """One grid step: `Bt` batches of the (S, S) phase-aware binary attention mask.

    re_ref : (Bt, S, C)  r_embed slab                 (column / query-side view)
    ret_ref: (Bt, C, S)  pre-transposed r_embed slab  (row / key-side view)
    out_ref: (Bt, S, S)  attention mask output
    """
    bt, s, c = re_ref.shape
    n = s * s

    if causal:
        row_i = lax.broadcasted_iota(jnp.int32, (s, s), 0)
        col_i = lax.broadcasted_iota(jnp.int32, (s, s), 1)
        causal_mask = col_i <= row_i          # hoisted: shared by every batch in the slab

    for b in range(bt):                       # static unroll over the folded batches
        cols = re_ref[b]                      # (S, C)
        rows = ret_ref[b]                     # (C, S)

        # Pairwise differences / squared distances via (S,1)-(1,S) broadcasts (no in-kernel transpose).
        dx = cols[:, 0:1] - rows[0:1, :]      # (S, S): r[i,0] - r[j,0]
        dy = cols[:, 1:2] - rows[1:2, :]      # (S, S): r[i,1] - r[j,1]
        dist_sq = dx * dx + dy * dy
        for ch in range(2, c):                # extra embedding channels contribute to distance only
            d = cols[:, ch:ch + 1] - rows[ch:ch + 1, :]
            dist_sq = dist_sq + d * d

        # threshold = mean + factor * std (unbiased), single pass over dist_sq (sum & sum of squares).
        s1 = jnp.sum(dist_sq, keepdims=True)             # (1, 1)
        s2 = jnp.sum(dist_sq * dist_sq, keepdims=True)   # (1, 1)
        mean_d = s1 * (1.0 / n)
        var_d = jnp.maximum((s2 - s1 * mean_d) * (1.0 / (n - 1)), 0.0)
        threshold = mean_d + threshold_factor * jnp.sqrt(var_d)

        valid = dist_sq <= threshold
        if causal:
            valid = jnp.logical_and(valid, causal_mask)
            # forward_bias = 0.5*(1 + cos(atan2(dy, dx))) == 0.5*(1 + dx/sqrt(dx^2+dy^2));
            # atan2(0, 0) == 0 so the bias is 1 when dist_sq == 0 (i == j or duplicate points).
            pos = dist_sq > 0.0
            safe = jnp.where(pos, dist_sq, 1.0)
            cos_phase = jnp.where(pos, dx * lax.rsqrt(safe), 1.0)
            forward_bias = 0.5 * (1.0 + cos_phase)
            out_ref[b] = jnp.where(valid, forward_bias, 0.0)
        else:
            out_ref[b] = valid.astype(jnp.float32)


def phase_aware_binary_attention(r_embed, *, threshold_factor=1.25, causal=True, batch_tile=None):
    """Pallas TPU implementation of PhaseAwareBinaryAttention.forward."""
    B, S, C = r_embed.shape
    assert C >= 2, "phase computation needs at least 2 embedding channels"
    if batch_tile is None:
        # Fold batches into each grid step, but keep >= 2 "parallel" steps when possible (v7x dual TC).
        batch_tile = B // 2 if (B % 2 == 0 and B >= 2) else 1
    assert B % batch_tile == 0

    r = r_embed.astype(jnp.float32)
    r_t = jnp.transpose(r, (0, 2, 1))   # tiny (B, C, S) row-broadcast view; avoids in-kernel transpose

    kernel = functools.partial(
        _phase_mask_kernel,
        threshold_factor=float(threshold_factor),
        causal=bool(causal),
    )
    return pl.pallas_call(
        kernel,
        out_shape=jax.ShapeDtypeStruct((B, S, S), jnp.float32),
        grid=(B // batch_tile,),
        in_specs=[
            pl.BlockSpec((batch_tile, S, C), lambda i: (i, 0, 0)),
            pl.BlockSpec((batch_tile, C, S), lambda i: (i, 0, 0)),
        ],
        out_specs=pl.BlockSpec((batch_tile, S, S), lambda i: (i, 0, 0)),
        compiler_params=pltpu.CompilerParams(dimension_semantics=("parallel",)),
    )(r, r_t)


def reference(r_embed, threshold_factor=1.25, causal=True):
    """Pure-JAX mirror of the PyTorch forward pass (for correctness check)."""
    r = r_embed.astype(jnp.float32)
    B, S, C = r.shape
    diff = r[:, :, None, :] - r[:, None, :, :]
    dist_sq = jnp.sum(diff ** 2, axis=-1)
    phase = jnp.arctan2(diff[..., 1], diff[..., 0])
    forward_bias = 0.5 * (1.0 + jnp.cos(phase))
    mean_d = jnp.mean(dist_sq, axis=(-1, -2), keepdims=True)
    std_d = jnp.std(dist_sq, axis=(-1, -2), keepdims=True, ddof=1)
    thr = mean_d + threshold_factor * std_d
    if causal:
        causal_mask = jnp.tril(jnp.ones((S, S), dtype=bool))
        valid = (dist_sq <= thr) & causal_mask[None]
        return valid.astype(jnp.float32) * forward_bias
    return (dist_sq <= thr).astype(jnp.float32)


if __name__ == "__main__":
    B, S, C = 4, 16, 2
    key = jax.random.PRNGKey(0)
    r_embed = jax.random.normal(key, (B, S, C), jnp.float32)

    out = phase_aware_binary_attention(r_embed)     # default: threshold_factor=1.25, causal=True
    out = jax.block_until_ready(out)

    ref = reference(r_embed)
    if not np.allclose(np.asarray(out), np.asarray(ref), rtol=1e-4, atol=1e-4):
        max_err = float(np.max(np.abs(np.asarray(out) - np.asarray(ref))))
        raise AssertionError(f"kernel mismatch vs reference, max abs err = {max_err}")

    print("KERNEL_OK")
</pallas_src>

<mosaic_0001>
module attributes {stable_mosaic.version = 11 : i64} {
  func.func @_phase_mask_kernel(%arg0: i32, %arg1: memref<2x16x2xf32, #tpu.memory_space<vmem>>, %arg2: memref<2x2x16xf32, #tpu.memory_space<vmem>>, %arg3: memref<2x16x16xf32, #tpu.memory_space<vmem>>) attributes {dimension_semantics = [#tpu.dimension_semantics<parallel>], iteration_bounds = array<i64: 2>, scalar_prefetch = 0 : i64, scratch_operands = 0 : i64, tpu.core_type = #tpu.core_type<tc>, window_params = [{transform_indices = @transform_0, window_bounds = array<i64: 2, 16, 2>}, {transform_indices = @transform_1, window_bounds = array<i64: 2, 2, 16>}, {transform_indices = @transform_2, window_bounds = array<i64: 2, 16, 16>}]} {
    %0 = tpu.iota {dimensions = array<i32: 0>} : vector<16x16xi32>
    %1 = tpu.iota {dimensions = array<i32: 1>} : vector<16x16xi32>
    %2 = arith.cmpi sle, %1, %0 : vector<16x16xi32>
    %c0 = arith.constant 0 : index
    %c0_0 = arith.constant 0 : index
    %c0_1 = arith.constant 0 : index
    %3 = vector.load %arg1[%c0, %c0_0, %c0_1] : memref<2x16x2xf32, #tpu.memory_space<vmem>>, vector<1x16x2xf32>
    %4 = vector.shape_cast %3 : vector<1x16x2xf32> to vector<16x2xf32>
    %c0_2 = arith.constant 0 : index
    %c0_3 = arith.constant 0 : index
    %c0_4 = arith.constant 0 : index
    %5 = vector.load %arg2[%c0_2, %c0_3, %c0_4] : memref<2x2x16xf32, #tpu.memory_space<vmem>>, vector<1x2x16xf32>
    %6 = vector.shape_cast %5 : vector<1x2x16xf32> to vector<2x16xf32>
    %7 = vector.extract_strided_slice %4 {offsets = [0, 0], sizes = [16, 1], strides = [1, 1]} : vector<16x2xf32> to vector<16x1xf32>
    %8 = vector.extract_strided_slice %6 {offsets = [0, 0], sizes = [1, 16], strides = [1, 1]} : vector<2x16xf32> to vector<1x16xf32>
    %9 = vector.broadcast %7 : vector<16x1xf32> to vector<16x16xf32>
    %10 = vector.broadcast %8 : vector<1x16xf32> to vector<16x16xf32>
    %11 = arith.subf %9, %10 : vector<16x16xf32>
    %12 = vector.extract_strided_slice %4 {offsets = [0, 1], sizes = [16, 1], strides = [1, 1]} : vector<16x2xf32> to vector<16x1xf32>
    %13 = vector.extract_strided_slice %6 {offsets = [1, 0], sizes = [1, 16], strides = [1, 1]} : vector<2x16xf32> to vector<1x16xf32>
    %14 = vector.broadcast %12 : vector<16x1xf32> to vector<16x16xf32>
    %15 = vector.broadcast %13 : vector<1x16xf32> to vector<16x16xf32>
    %16 = arith.subf %14, %15 : vector<16x16xf32>
    %17 = arith.mulf %11, %11 : vector<16x16xf32>
    %18 = arith.mulf %16, %16 : vector<16x16xf32>
    %19 = arith.addf %17, %18 : vector<16x16xf32>
    %20 = vector.shape_cast %19 : vector<16x16xf32> to vector<1x16x16xf32>
    %cst = arith.constant dense<0.000000e+00> : vector<1xf32>
    %21 = vector.multi_reduction <add>, %20, %cst [1, 2] : vector<1x16x16xf32> to vector<1xf32>
    %22 = vector.shape_cast %21 : vector<1xf32> to vector<1x1x1xf32>
    %23 = vector.extract %22[0, 0, 0] : f32 from vector<1x1x1xf32>
    %24 = vector.broadcast %23 : f32 to vector<1x1xf32>
    %25 = arith.mulf %19, %19 : vector<16x16xf32>
    %26 = vector.shape_cast %25 : vector<16x16xf32> to vector<1x16x16xf32>
    %cst_5 = arith.constant dense<0.000000e+00> : vector<1xf32>
    %27 = vector.multi_reduction <add>, %26, %cst_5 [1, 2] : vector<1x16x16xf32> to vector<1xf32>
    %28 = vector.shape_cast %27 : vector<1xf32> to vector<1x1x1xf32>
    %29 = vector.extract %28[0, 0, 0] : f32 from vector<1x1x1xf32>
    %30 = vector.broadcast %29 : f32 to vector<1x1xf32>
    %cst_6 = arith.constant 3.906250e-03 : f32
    %31 = vector.broadcast %cst_6 : f32 to vector<1x1xf32>
    %32 = arith.mulf %24, %31 : vector<1x1xf32>
    %33 = arith.mulf %24, %32 : vector<1x1xf32>
    %34 = arith.subf %30, %33 : vector<1x1xf32>
    %cst_7 = arith.constant 0.00392156886 : f32
    %35 = vector.broadcast %cst_7 : f32 to vector<1x1xf32>
    %36 = arith.mulf %34, %35 : vector<1x1xf32>
    %cst_8 = arith.constant 0.000000e+00 : f32
    %37 = vector.broadcast %cst_8 : f32 to vector<1x1xf32>
    %38 = arith.maximumf %36, %37 : vector<1x1xf32>
    %39 = math.sqrt %38 : vector<1x1xf32>
    %cst_9 = arith.constant 1.250000e+00 : f32
    %40 = vector.broadcast %cst_9 : f32 to vector<1x1xf32>
    %41 = arith.mulf %40, %39 : vector<1x1xf32>
    %42 = arith.addf %32, %41 : vector<1x1xf32>
    %43 = vector.broadcast %42 : vector<1x1xf32> to vector<16x16xf32>
    %44 = arith.cmpf ole, %19, %43 : vector<16x16xf32>
    %45 = arith.andi %44, %2 : vector<16x16xi1>
    %cst_10 = arith.constant 0.000000e+00 : f32
    %46 = vector.broadcast %cst_10 : f32 to vector<16x16xf32>
    %47 = arith.cmpf ogt, %19, %46 : vector<16x16xf32>
    %cst_11 = arith.constant 1.000000e+00 : f32
    %48 = vector.broadcast %cst_11 : f32 to vector<16x16xf32>
    %49 = arith.select %47, %19, %48 : vector<16x16xi1>, vector<16x16xf32>
    %50 = math.rsqrt %49 : vector<16x16xf32>
    %51 = arith.mulf %11, %50 : vector<16x16xf32>
    %cst_12 = arith.constant 1.000000e+00 : f32
    %52 = vector.broadcast %cst_12 : f32 to vector<16x16xf32>
    %53 = arith.select %47, %51, %52 : vector<16x16xi1>, vector<16x16xf32>
    %cst_13 = arith.constant 1.000000e+00 : f32
    %54 = vector.broadcast %cst_13 : f32 to vector<16x16xf32>
    %55 = arith.addf %54, %53 : vector<16x16xf32>
    %cst_14 = arith.constant 5.000000e-01 : f32
    %56 = vector.broadcast %cst_14 : f32 to vector<16x16xf32>
    %57 = arith.mulf %56, %55 : vector<16x16xf32>
    %cst_15 = arith.constant 0.000000e+00 : f32
    %58 = vector.broadcast %cst_15 : f32 to vector<16x16xf32>
    %59 = arith.select %45, %57, %58 : vector<16x16xi1>, vector<16x16xf32>
    %c0_16 = arith.constant 0 : index
    %c0_17 = arith.constant 0 : index
    %c0_18 = arith.constant 0 : index
    %60 = vector.load %arg3[%c0_16, %c0_17, %c0_18] : memref<2x16x16xf32, #tpu.memory_space<vmem>>, vector<1x16x16xf32>
    %61 = vector.shape_cast %60 : vector<1x16x16xf32> to vector<16x16xf32>
    %62 = vector.shape_cast %59 : vector<16x16xf32> to vector<1x16x16xf32>
    tpu.vector_store %arg3[%c0_16, %c0_17, %c0_18], %62 {strides = array<i32>} : memref<2x16x16xf32, #tpu.memory_space<vmem>>, vector<1x16x16xf32>,
    %c1 = arith.constant 1 : index
    %c0_19 = arith.constant 0 : index
    %c0_20 = arith.constant 0 : index
    %63 = vector.load %arg1[%c1, %c0_19, %c0_20] : memref<2x16x2xf32, #tpu.memory_space<vmem>>, vector<1x16x2xf32>
    %64 = vector.shape_cast %63 : vector<1x16x2xf32> to vector<16x2xf32>
    %c1_21 = arith.constant 1 : index
    %c0_22 = arith.constant 0 : index
    %c0_23 = arith.constant 0 : index
    %65 = vector.load %arg2[%c1_21, %c0_22, %c0_23] : memref<2x2x16xf32, #tpu.memory_space<vmem>>, vector<1x2x16xf32>
    %66 = vector.shape_cast %65 : vector<1x2x16xf32> to vector<2x16xf32>
    %67 = vector.extract_strided_slice %64 {offsets = [0, 0], sizes = [16, 1], strides = [1, 1]} : vector<16x2xf32> to vector<16x1xf32>
    %68 = vector.extract_strided_slice %66 {offsets = [0, 0], sizes = [1, 16], strides = [1, 1]} : vector<2x16xf32> to vector<1x16xf32>
    %69 = vector.broadcast %67 : vector<16x1xf32> to vector<16x16xf32>
    %70 = vector.broadcast %68 : vector<1x16xf32> to vector<16x16xf32>
    %71 = arith.subf %69, %70 : vector<16x16xf32>
    %72 = vector.extract_strided_slice %64 {offsets = [0, 1], sizes = [16, 1], strides = [1, 1]} : vector<16x2xf32> to vector<16x1xf32>
    %73 = vector.extract_strided_slice %66 {offsets = [1, 0], sizes = [1, 16], strides = [1, 1]} : vector<2x16xf32> to vector<1x16xf32>
    %74 = vector.broadcast %72 : vector<16x1xf32> to vector<16x16xf32>
    %75 = vector.broadcast %73 : vector<1x16xf32> to vector<16x16xf32>
    %76 = arith.subf %74, %75 : vector<16x16xf32>
    %77 = arith.mulf %71, %71 : vector<16x16xf32>
    %78 = arith.mulf %76, %76 : vector<16x16xf32>
    %79 = arith.addf %77, %78 : vector<16x16xf32>
    %80 = vector.shape_cast %79 : vector<16x16xf32> to vector<1x16x16xf32>
    %cst_24 = arith.constant dense<0.000000e+00> : vector<1xf32>
    %81 = vector.multi_reduction <add>, %80, %cst_24 [1, 2] : vector<1x16x16xf32> to vector<1xf32>
    %82 = vector.shape_cast %81 : vector<1xf32> to vector<1x1x1xf32>
    %83 = vector.extract %82[0, 0, 0] : f32 from vector<1x1x1xf32>
    %84 = vector.broadcast %83 : f32 to vector<1x1xf32>
    %85 = arith.mulf %79, %79 : vector<16x16xf32>
    %86 = vector.shape_cast %85 : vector<16x16xf32> to vector<1x16x16xf32>
    %cst_25 = arith.constant dense<0.000000e+00> : vector<1xf32>
    %87 = vector.multi_reduction <add>, %86, %cst_25 [1, 2] : vector<1x16x16xf32> to vector<1xf32>
    %88 = vector.shape_cast %87 : vector<1xf32> to vector<1x1x1xf32>
    %89 = vector.extract %88[0, 0, 0] : f32 from vector<1x1x1xf32>
    %90 = vector.broadcast %89 : f32 to vector<1x1xf32>
    %cst_26 = arith.constant 3.906250e-03 : f32
    %91 = vector.broadcast %cst_26 : f32 to vector<1x1xf32>
    %92 = arith.mulf %84, %91 : vector<1x1xf32>
    %93 = arith.mulf %84, %92 : vector<1x1xf32>
    %94 = arith.subf %90, %93 : vector<1x1xf32>
    %cst_27 = arith.constant 0.00392156886 : f32
    %95 = vector.broadcast %cst_27 : f32 to vector<1x1xf32>
    %96 = arith.mulf %94, %95 : vector<1x1xf32>
    %cst_28 = arith.constant 0.000000e+00 : f32
    %97 = vector.broadcast %cst_28 : f32 to vector<1x1xf32>
    %98 = arith.maximumf %96, %97 : vector<1x1xf32>
    %99 = math.sqrt %98 : vector<1x1xf32>
    %cst_29 = arith.constant 1.250000e+00 : f32
    %100 = vector.broadcast %cst_29 : f32 to vector<1x1xf32>
    %101 = arith.mulf %100, %99 : vector<1x1xf32>
    %102 = arith.addf %92, %101 : vector<1x1xf32>
    %103 = vector.broadcast %102 : vector<1x1xf32> to vector<16x16xf32>
    %104 = arith.cmpf ole, %79, %103 : vector<16x16xf32>
    %105 = arith.andi %104, %2 : vector<16x16xi1>
    %cst_30 = arith.constant 0.000000e+00 : f32
    %106 = vector.broadcast %cst_30 : f32 to vector<16x16xf32>
    %107 = arith.cmpf ogt, %79, %106 : vector<16x16xf32>
    %cst_31 = arith.constant 1.000000e+00 : f32
    %108 = vector.broadcast %cst_31 : f32 to vector<16x16xf32>
    %109 = arith.select %107, %79, %108 : vector<16x16xi1>, vector<16x16xf32>
    %110 = math.rsqrt %109 : vector<16x16xf32>
    %111 = arith.mulf %71, %110 : vector<16x16xf32>
    %cst_32 = arith.constant 1.000000e+00 : f32
    %112 = vector.broadcast %cst_32 : f32 to vector<16x16xf32>
    %113 = arith.select %107, %111, %112 : vector<16x16xi1>, vector<16x16xf32>
    %cst_33 = arith.constant 1.000000e+00 : f32
    %114 = vector.broadcast %cst_33 : f32 to vector<16x16xf32>
    %115 = arith.addf %114, %113 : vector<16x16xf32>
    %cst_34 = arith.constant 5.000000e-01 : f32
    %116 = vector.broadcast %cst_34 : f32 to vector<16x16xf32>
    %117 = arith.mulf %116, %115 : vector<16x16xf32>
    %cst_35 = arith.constant 0.000000e+00 : f32
    %118 = vector.broadcast %cst_35 : f32 to vector<16x16xf32>
    %119 = arith.select %105, %117, %118 : vector<16x16xi1>, vector<16x16xf32>
    %c1_36 = arith.constant 1 : index
    %c0_37 = arith.constant 0 : index
    %c0_38 = arith.constant 0 : index
    %120 = vector.load %arg3[%c1_36, %c0_37, %c0_38] : memref<2x16x16xf32, #tpu.memory_space<vmem>>, vector<1x16x16xf32>
    %121 = vector.shape_cast %120 : vector<1x16x16xf32> to vector<16x16xf32>
    %122 = vector.shape_cast %119 : vector<16x16xf32> to vector<1x16x16xf32>
    tpu.vector_store %arg3[%c1_36, %c0_37, %c0_38], %122 {strides = array<i32>} : memref<2x16x16xf32, #tpu.memory_space<vmem>>, vector<1x16x16xf32>,
    return
  }
  func.func @transform_0(%arg0: i32) -> (i32, i32, i32) {
    %c0_i32 = arith.constant 0 : i32
    %c0_i32_0 = arith.constant 0 : i32
    %c0_i32_1 = arith.constant 0 : i32
    return %arg0, %c0_i32, %c0_i32_0 : i32, i32, i32
  }
  func.func @transform_1(%arg0: i32) -> (i32, i32, i32) {
    %c0_i32 = arith.constant 0 : i32
    %c0_i32_0 = arith.constant 0 : i32
    %c0_i32_1 = arith.constant 0 : i32
    return %arg0, %c0_i32, %c0_i32_0 : i32, i32, i32
  }
  func.func @transform_2(%arg0: i32) -> (i32, i32, i32) {
    %c0_i32 = arith.constant 0 : i32
    %c0_i32_0 = arith.constant 0 : i32
    %c0_i32_1 = arith.constant 0 : i32
    return %arg0, %c0_i32, %c0_i32_0 : i32, i32, i32
  }
}

</mosaic_0001>

<bundles_post_ra>
// kernel: tpu_custom_call.1
= control target key start
LH: loop header
LB: loop body
LE: loop exit
PB: predicated region body
PF: predicated region fallthrough
CT: control target
= control target key end

     0   :  { %7 = vsyncpa [#allocation3], 0  ;;  %s866_s0 = inlined_call_operand.vmem [shape: f32[4,16,2], index: 0, kind: input, shape index: {}]   ;;  %s867_s1 = inlined_call_operand.vmem [shape: f32[4,2,16], index: 1, kind: input, shape index: {}]   ;;  %s868_s2 = inlined_call_operand.hbm [shape: f32[4,16,16], index: 2, kind: output, shape index: {}]  }
   0x1   :  { %9 = vsyncpa [#allocation3 + $0x1], 0  ;;  %s652_s9 = smov 0   ;;  %s654_s10 = smov 0  }
   0x2   :  { %s656_s11 = smov 0   ;;  %s658_s12 = smov 0  }
   0x3 LB: > { %s673_s13 = sadd.s32 4294967295, %s630_s12   ;;  %s476_s14 = sadd.s32 4294967294, %s630_s12   ;;  %s630_s12 = sphi %s658_s12, %s874_s12   ;;  %s626_s11 = sphi %s656_s11, %s873_s11   ;;  %s622_s10 = sphi %s654_s10, %s872_s10   ;;  %s618_s9 = sphi %s652_s9, %s871_s9  }
   0x4   : > { %s677_s15 = sadd.s32 1, %s630_s12   ;;  %s74_s16 = sadd.s32 1, %s626_s11 }
   0x5   : > { %s71_s17 = ssub.s32 %s630_s12, %s677_s15  ;;  %p84_p0 = scmp.ne.s32.totalorder %s626_s11, %s622_s10 }
   0x6   : > { %p72_p1 = scmp.eq.s32.totalorder %s71_s17, 0  ;;  %p85_p2 = scmp.eq.s32.totalorder %s673_s13, 1 }
   0x7   : > { %p90_p3 = scmp.ne.s32.totalorder %s622_s10, %s618_s9  ;;  %p91_p4 = scmp.eq.s32.totalorder %s476_s14, 1 }
   0x8   : > { %s688_s18 = scalar_select %p72_p1, %s626_s11, %s74_s16  }
   0x9   : > { %p690_p5 = por %p85_p2, %p84_p0  ;;  %p694_p6 = por %p91_p4, %p90_p3 }
   0xa   : > { %p479_p7 = scmp.ge.s32.totalorder %s630_s12, 1  ;;  %p128_p8 = scmp.lt.s32.totalorder %s630_s12, 3 }
   0xc   : > { %p129_p9 = pnand %p479_p7, %p128_p8 }
   0xd   : > { %s481_s21 = sshll.u32 (!%p129_p9), %s673_s13, 1  ;;  %v170_v0 = vlaneseq (!%p129_p9)  ;;  %v632_v1 = vmov (!%p129_p9), 1   ;;  %v633_v2 = vmov (!%p129_p9), 0   ;;  %vm216_vm2 = vcmask (!%p129_p9), 130048   ;;  %s153_s6 = sand.u32 (!%p129_p9), 1, %s622_s10  }
   0xe   : > { %132 = sbr.rel (%p129_p9) target bundleno = 429 (0x1ad), region = 28  ;;  %552 = vset.pattern.permute.xlu1 (!%p129_p9), %v632_v1  ;;  %551 = vset.pattern.permute.xlu0 (!%p129_p9), %v633_v2  ;;  %p157_p10 = scmp.lt.s32.totalorder (!%p129_p9), %s481_s21, 3 }
   0xf   : > { %v701_v3 = vshrl.u32 (!%p129_p9), %v170_v0, 7  ;;  %v703_v4 = vand.u32 (!%p129_p9), 127, %v170_v0  ;;  %s480_s7 = sshll.u32 (!%p129_p9), %s153_s6, 5  ;;  %s499_s14 = sshll.u32 (!%p129_p9), %s673_s13, 9 }
  0x10   : > { %s155_s8 = scalar_lea.vmem (!%p129_p9), [#allocation2], %s480_s7  ;;  %s825_s13 = scalar_lea.sflag (!%p129_p9), [#allocation3], %s153_s6 }
  0x11   : > { %v706_v5 = vadd.s32 (!%p129_p9), 8, %v701_v3  ;;  %vm175_vm0 = vcmp.le.s32.totalorder (!%p129_p9), %v703_v4, %v701_v3  ;;  %v206_v10 = vsub.s32 (!%p129_p9), 1, %v701_v3  ;;  %v192_v11 = vsub.s32 (!%p129_p9), 0, %v701_v3  ;;  %s402_s16 = sshll.u32 (!%p129_p9), %s155_s8, 4  ;;  %s634_s24 = smov (!%p129_p9), [#allocation2]   ;;  %s816_s16 = int_to_ptr.vmem [resolvable:$true] %s402_s16 }
  0x12   : > { %s568_s23 = scalar_lea.vmem (!%p129_p9), %s816_s16, 512 }
  0x13   : > { %vm176_vm1 = vcmp.le.s32.totalorder (!%p129_p9), %v703_v4, %v706_v5  ;;  %p569_p11 = scmp.ne.s32.totalorder (!%p129_p9), %s816_s16, %s568_s23 }
  0x15   : > { %s876_s21 = smov (!%p157_p10, %s481_s21), 3  ;;  %p570_p12 = pnand %p569_p11, %p690_p5 }
  0x16   : > { %s497_s22 = sshll.u32 %s876_s21, 4  ;;  %s485_s26 = sshll.u32 %s876_s21, 1 }
  0x17   : > { %s161_s25 = scalar_lea.vmem %s866_s0, %s497_s22  ;;  %s167_s29 = scalar_lea.vmem %s867_s1, %s485_s26 }
  0x18   : > { %v177_v6 = vld [vmem:[%s161_s25] sm:$0xff]  ;;  %v178_v7 = vld [vmem:[%s161_s25 + $0x8] sm:$0xff]  ;;  %v486_v8 = vld [vmem:[%s161_s25 + $0x10] sm:$0xff]  ;;  %s814_s22 = scalar_lea.hbm %s868_s2, %s499_s14  ;;  %p571_p13 = pneg %p570_p12 }
  0x19   : > { %197 = vperm.xlu1 %552, %v177_v6   ;;  %182 = vperm.xlu0 %551, %v177_v6   ;;  %v487_v9 = vld [vmem:[%s161_s25 + $0x18] sm:$0xff]  ;;  %v179_v12 = vld [vmem:[%s167_s29] sm:$0x3]  ;;  %v488_v26 = vld [vmem:[%s167_s29 + $0x2] sm:$0x3]  ;;  %s572_s25 = sshll.u32 %s634_s24, 4  ;;  %s573_s25 = int_to_ptr.vmem [resolvable:$false] %s572_s25 }
  0x1a   : > { %v207_v13 = vrot.slane %v179_v12, %v206_v10  ;;  %v193_v14 = vrot.slane %v179_v12, %v192_v11  ;;  %v299_v29 = vrot.slane %v488_v26, %v192_v11  ;;  %v313_v34 = vrot.slane %v488_v26, %v206_v10  ;;  %s574_s26 = scalar_lea.vmem %s573_s25, 1024  ;;  %p575_p0 = scmp.lt.s32.totalorder %s816_s16, %s573_s25 }
  0x1b   : > { %p576_p1 = scmp.lt.s32.totalorder %s574_s26, %s568_s23 }
  0x1d   : > { %201 = vperm.xlu1 %552, %v178_v7   ;;  %187 = vperm.xlu0 %551, %v178_v7   ;;  %p577_p2 = por %p576_p1, %p575_p0 }
  0x1f   : > { %p578_p3 = pnand %p577_p2, %p571_p13 }
  0x21   : > { %553 = vset.pattern.permute.xlu1 %v633_v2  ;;  %288 = vperm.xlu0 %551, %v486_v8  }
  0x22   : > { %293 = vperm.xlu1 %553, %v487_v9  }
  0x25   : > { %554 = vset.pattern.permute.xlu0 %v632_v1 }
  0x26   : > { %555 = vset.pattern.permute.xlu1 %v632_v1  ;;  %303 = vperm.xlu0 %554, %v486_v8  }
  0x27   : > { %307 = vperm.xlu1 %555, %v487_v9  }
  0x98   : > { %v198_v15 = vpop.permute.xlu1 %197  ;;  %v183_v16 = vpop.permute.xlu0 %182 }
  0x99   : > { %v208_v17 = vsub.f32 %v198_v15, %v207_v13  ;;  %v720_v18 = vsub.f32 %v183_v16, %v193_v14 }
  0x9b   : > { %v212_v19 = vmul.f32 %v208_v17, %v208_v17  ;;  %v210_v20 = vmul.f32 %v720_v18, %v720_v18 }
  0x9c   : > { %v202_v21 = vpop.permute.xlu1 %201  ;;  %v188_v22 = vpop.permute.xlu0 %187 }
  0x9d   : > { %v724_v23 = vadd.f32 %v212_v19, %v210_v20  ;;  %v209_v24 = vsub.f32 %v202_v21, %v207_v13  ;;  %v726_v25 = vsub.f32 %v188_v22, %v193_v14 }
  0x9f   : > { %v213_v27 = vmul.f32 %v209_v24, %v209_v24  ;;  %v211_v28 = vmul.f32 %v726_v25, %v726_v25  ;;  %v230_v33 = vmul.f32 %v724_v23, %v724_v23  ;;  %v217_v35 = vsel %vm216_vm2, %v724_v23, 0.0 }
  0xa0   : > { %v289_v30 = vpop.permute.xlu0 %288  ;;  %vm263_vm3 = vcmp.gt.f32.partialorder %v724_v23, 0.0 }
  0xa1   : > { %v730_v31 = vadd.f32 %v213_v27, %v211_v28  ;;  %v294_v32 = vpop.permute.xlu1 %293  ;;  %v740_v38 = vsub.f32 %v289_v30, %v299_v29  ;;  %v232_v42 = vsel %vm216_vm2, %v230_v33, 0.0 }
  0xa2   : > { %v742_v40 = vsub.f32 %v294_v32, %v299_v29 }
  0xa3   : > { %v218_v36 = vsel %vm216_vm2, %v730_v31, 0.0  ;;  %v231_v37 = vmul.f32 %v730_v31, %v730_v31  ;;  %v316_v48 = vmul.f32 %v740_v38, %v740_v38  ;;  %vm264_vm4 = vcmp.gt.f32.partialorder %v730_v31, 0.0 }
  0xa4   : > { %v219_v39 = vadd.f32 %v218_v36, %v217_v35  ;;  %v317_v50 = vmul.f32 %v742_v40, %v742_v40  ;;  %v265_v35 = vsel %vm263_vm3, %v724_v23, 1.0 }
  0xa5   : > { %v304_v41 = vpop.permute.xlu0 %303  ;;  %v233_v43 = vsel %vm216_vm2, %v231_v37, 0.0  ;;  %v266_v37 = vsel %vm264_vm4, %v730_v31, 1.0  ;;  %556 = vrsqrt.f32 %v265_v35 }
  0xa6   : > { %v314_v44 = vsub.f32 %v304_v41, %v313_v34  ;;  %v308_v45 = vpop.permute.xlu1 %307  ;;  %220 = vadd.xlane.f32.xlu1 %v219_v39  ;;  %v234_v46 = vadd.f32 %v233_v43, %v232_v42  ;;  %558 = vrsqrt.f32 %v266_v37 }
  0xa7   : > { %v315_v47 = vsub.f32 %v308_v45, %v313_v34 }
  0xa8   : > { %v318_v49 = vmul.f32 %v314_v44, %v314_v44  ;;  %235 = vadd.xlane.f32.xlu0 %v234_v46 }
  0xa9   : > { %v319_v51 = vmul.f32 %v315_v47, %v315_v47 }
  0xaa   : > { %v750_v52 = vadd.f32 %v318_v49, %v316_v48 }
  0xab   : > { %v752_v53 = vadd.f32 %v319_v51, %v317_v50 }
  0xac   : > { %v322_v54 = vsel %vm216_vm2, %v750_v52, 0.0  ;;  %v335_v55 = vmul.f32 %v750_v52, %v750_v52  ;;  %vm368_vm5 = vcmp.gt.f32.partialorder %v750_v52, 0.0 }
  0xad   : > { %v323_v56 = vsel %vm216_vm2, %v752_v53, 0.0  ;;  %v336_v57 = vmul.f32 %v752_v53, %v752_v53  ;;  %vm369_vm6 = vcmp.gt.f32.partialorder %v752_v53, 0.0  ;;  %v370_v46 = vsel %vm368_vm5, %v750_v52, 1.0 }
  0xae   : > { %v324_v58 = vadd.f32 %v323_v56, %v322_v54  ;;  %v337_v59 = vsel %vm216_vm2, %v335_v55, 0.0  ;;  %v371_v48 = vsel %vm369_vm6, %v752_v53, 1.0 }
  0xaf   : > { %v338_v60 = vsel %vm216_vm2, %v336_v57, 0.0  ;;  %v557_v50 = vpop.eup %556 }
  0xb0   : > { %325 = vadd.xlane.f32.xlu0 %v324_v58  ;;  %v339_v61 = vadd.f32 %v338_v60, %v337_v59  ;;  %v559_v54 = vpop.eup %558  ;;  %v269_v56 = vmul.f32 %v557_v50, %v720_v18 }
  0xb1   : > { %v270_v57 = vmul.f32 %v559_v54, %v726_v25 }
  0xb2   : > { %340 = vadd.xlane.f32.xlu1 %v339_v61  ;;  %v271_v61 = vsel %vm263_vm3, %v269_v56, 1.0 }
  0xb3   : > { %v273_v18 = vadd.f32 1.0, %v271_v61 }
 0x133   : > { %v221_v62 = vpop.xlane.xlu1 %220 }
 0x134   : > { %v222_v63 = vrot.slane %v221_v62, 4 }
 0x135   : > { %v236_v0 = vpop.xlane.xlu0 %235 }
 0x136   : > { %v223_v1 = vadd.f32 %v222_v63, %v221_v62  ;;  %v237_v2 = vrot.slane %v236_v0, 4  ;;  %v272_v63 = vsel %vm264_vm4, %v270_v57, 1.0 }
 0x138   : > { %v224_v6 = vrot.slane %v223_v1, 2  ;;  %v238_v7 = vadd.f32 %v237_v2, %v236_v0 }
 0x13a   : > { %v239_v8 = vrot.slane %v238_v7, 2  ;;  %v225_v9 = vadd.f32 %v224_v6, %v223_v1  ;;  %v274_v6 = vadd.f32 1.0, %v272_v63 }
 0x13c   : > { %v226_v10 = vrot.slane %v225_v9, 1  ;;  %v240_v11 = vadd.f32 %v239_v8, %v238_v7 }
 0x13d   : > { %v326_v12 = vpop.xlane.xlu0 %325 }
 0x13e   : > { %v327_v13 = vrot.slane %v326_v12, 4  ;;  %v227_v14 = vadd.f32 %v226_v10, %v225_v9  ;;  %v241_v15 = vrot.slane %v240_v11, 1  ;;  %v275_v9 = vmul.f32 0.5, %v273_v18 }
 0x13f   : > { %v341_v16 = vpop.xlane.xlu1 %340 }
 0x140   : > { %v328_v17 = vadd.f32 %v327_v13, %v326_v12  ;;  %v342_v19 = vrot.slane %v341_v16, 4  ;;  %500 = vpush %v227_v14  ;;  %v242_v20 = vadd.f32 %v241_v15, %v240_v11  ;;  %v276_v11 = vmul.f32 0.5, %v274_v6 }
 0x142   : > { %v329_v21 = vrot.slane %v328_v17, 2  ;;  %v343_v22 = vadd.f32 %v342_v19, %v341_v16  ;;  %502 = vpush %v242_v20 }
 0x144   : > { %v330_v24 = vadd.f32 %v329_v21, %v328_v17  ;;  %v344_v26 = vrot.slane %v343_v22, 2 }
 0x146   : > { %v345_v27 = vadd.f32 %v344_v26, %v343_v22  ;;  %v331_v28 = vrot.slane %v330_v24, 1 }
 0x148   : > { %v332_v29 = vadd.f32 %v331_v28, %v330_v24  ;;  %v346_v30 = vrot.slane %v345_v27, 1 }
 0x14a   : > { %504 = vpush %v332_v29  ;;  %v347_v32 = vadd.f32 %v346_v30, %v345_v27 }
 0x14c   : > { %506 = vpush %v347_v32 }
 0x171   : > { %s501_s30 = spop %500 }
 0x172   : > { %v229_v33 = vstv %s501_s30 }
 0x173   : > { %v245_v34 = vmul.f32 0.00390625, %v229_v33  ;;  %s503_s3 = spop %502 }
 0x174   : > { %v244_v39 = vstv %s503_s3 }
 0x175   : > { %v246_v36 = vmul.f32 %v245_v34, %v229_v33 }
 0x177   : > { %v247_v41 = vsub.f32 %v244_v39, %v246_v36 }
 0x179   : > { %v248_v42 = vmul.f32 0.003921569, %v247_v41 }
 0x17b   : > { %v249_v43 = vmax.f32 %v248_v42, 0.0  ;;  %s505_s4 = spop %504 }
 0x17c   : > { %v334_v44 = vstv %s505_s4 }
 0x17d   : > { %560 = vrsqrt.f32 %v249_v43  ;;  %v350_v45 = vmul.f32 0.00390625, %v334_v44  ;;  %s507_s5 = spop %506  ;;  %vm252_vm7 = vcmp.eq.f32.partialorder %v249_v43, inf  ;;  %v255_v62 = vand.u32 2147483648, %v249_v43 }
 0x17e   : > { %v349_v49 = vstv %s507_s5  ;;  %562 = vrsqrt.f32 %v370_v46  ;;  %vm254_vm8 = vcmp.eq.f32.partialorder %v249_v43, 0.0 }
 0x17f   : > { %v351_v47 = vmul.f32 %v350_v45, %v334_v44  ;;  %564 = vrsqrt.f32 %v371_v48 }
 0x181   : > { %v352_v51 = vsub.f32 %v349_v49, %v351_v47 }
 0x183   : > { %v353_v55 = vmul.f32 0.003921569, %v352_v51 }
 0x185   : > { %v354_v58 = vmax.f32 %v353_v55, 0.0 }
 0x187   : > { %v561_v59 = vpop.eup %560  ;;  %566 = vrsqrt.f32 %v354_v58  ;;  %vm357_vm13 = vcmp.eq.f32.partialorder %v354_v58, inf  ;;  %vm359_vm14 = vcmp.eq.f32.partialorder %v354_v58, 0.0 }
 0x188   : > { %v251_v60 = vmul.f32 %v561_v59, %v249_v43  ;;  %v563_v25 = vpop.eup %562 }
 0x189   : > { %v565_v7 = vpop.eup %564  ;;  %v374_v10 = vmul.f32 %v563_v25, %v740_v38 }
 0x18a   : > { %v253_v0 = vsel %vm252_vm7, %v249_v43, %v251_v60  ;;  %v375_v12 = vmul.f32 %v565_v7, %v742_v40 }
 0x18b   : > { %v256_v1 = vsel %vm254_vm8, %v255_v62, %v253_v0 }
 0x18c   : > { %v257_v2 = vmul.f32 1.25, %v256_v1  ;;  %v377_v40 = vsel %vm369_vm6, %v375_v12, 1.0 }
 0x18d   : > { %v379_v21 = vadd.f32 1.0, %v377_v40 }
 0x18e   : > { %v258_v8 = vadd.f32 %v257_v2, %v245_v34 }
 0x18f   : > { %v381_v26 = vmul.f32 0.5, %v379_v21 }
 0x190   : > { %vm259_vm9 = vcmp.le.f32.partialorder %v724_v23, %v258_v8  ;;  %vm260_vm10 = vcmp.le.f32.partialorder %v730_v31, %v258_v8  ;;  %v376_v23 = vsel %vm368_vm5, %v374_v10, 1.0  ;;  %v360_v31 = vand.u32 2147483648, %v354_v58 }
 0x191   : > { %vm261_vm11 = vmand %vm259_vm9, %vm175_vm0  ;;  %v567_v13 = vpop.eup %566  ;;  %v378_v19 = vadd.f32 1.0, %v376_v23 }
 0x192   : > { %vm262_vm12 = vmand %vm260_vm10, %vm176_vm1  ;;  %v277_v14 = vsel %vm261_vm11, %v275_v9, 0.0  ;;  %v356_v15 = vmul.f32 %v567_v13, %v354_v58 }
 0x193   : > { %v278_v38 = vsel %vm262_vm12, %v276_v11, 0.0  ;;  %279 = vst.msk [vmem:[%s155_s8] sm:$0xff] %vm216_vm2, %v277_v14  ;;  %v380_v24 = vmul.f32 0.5, %v378_v19 }
 0x194   : > { %280 = vst.msk [vmem:[%s155_s8 + $0x8] sm:$0xff] %vm216_vm2, %v278_v38  ;;  %v358_v16 = vsel %vm357_vm13, %v354_v58, %v356_v15 }
 0x195   : > { %v361_v17 = vsel %vm359_vm14, %v360_v31, %v358_v16 }
 0x196   : > { %v362_v20 = vmul.f32 1.25, %v361_v17 }
 0x198   : > { %v363_v22 = vadd.f32 %v362_v20, %v350_v45 }
 0x19a   : > { %vm364_vm15 = vcmp.le.f32.partialorder %v750_v52, %v363_v22  ;;  %vm365_vm3 = vcmp.le.f32.partialorder %v752_v53, %v363_v22 }
 0x19b   : > { %vm366_vm4 = vmand %vm364_vm15, %vm175_vm0 }
 0x19c   : > { %vm367_vm5 = vmand %vm365_vm3, %vm176_vm1  ;;  %v382_v52 = vsel %vm366_vm4, %v380_v24, 0.0 }
 0x19d   : > { %v383_v53 = vsel %vm367_vm5, %v381_v26, 0.0  ;;  %489 = vst.msk [vmem:[%s155_s8 + $0x10] sm:$0xff] %vm216_vm2, %v382_v52 }
 0x19e   : > { %490 = vst.msk [vmem:[%s155_s8 + $0x18] sm:$0xff] %vm216_vm2, %v383_v53 }
 0x19f   : > { %581 = shalt.err (!%p578_p3)
}
 0x1a0   : > { %s582_s27 = scalar_lea.hbm %s814_s22, 512  ;;  %s586_s30 = scalar_lea.hbm %s868_s2, 1024 }
 0x1a1   : > { %p583_p4 = scmp.ne.s32.totalorder %s814_s22, %s582_s27  ;;  %p587_p9 = scmp.lt.u32.totalorder %s814_s22, %s868_s2 }
 0x1a2   : > { %p588_p10 = scmp.lt.u32.totalorder %s586_s30, %s582_s27  ;;  %p590_p12 = scmp.lt.u32.totalorder %s582_s27, %s814_s22 }
 0x1a3   : > { %p584_p7 = pnand %p583_p4, %p690_p5 }
 0x1a4   : > { %p589_p11 = por %p588_p10, %p587_p9 }
 0x1a5   : > { %p585_p8 = pneg %p584_p7 }
 0x1a6   : > { %p591_p13 = por %p590_p12, %p589_p11 }
 0x1a8   : > { %p592_p0 = pnand %p591_p13, %p585_p8 }
 0x1aa   : > { %595 = shalt.err (!%p592_p0)
}
 0x1ab   : > { %s635_s5 = smov 128   ;;  %s636_s6 = smov 8  }
 0x1ac   : > { %508 = dma.vmem_to_hbm [thread:$0]  (%p690_p5), %s816_s16, 512, %s814_s22, %s825_s13, %s635_s5, %s635_s5, %s636_s6  }
 0x1ad PF: > { %p514_p1 = scmp.ge.s32.totalorder %s630_s12, 2  ;;  %s417_s7 = sand.u32 1, %s618_s9  }
 0x1ae   : > { %s418_s8 = scalar_lea.sflag [#allocation3], %s417_s7 }
 0x1af   : > { %p511_p2 = pnand %p514_p1, %p694_p6 }
 0x1b1   : > { %613 = dma.done.wait (!%p511_p2), %s418_s8, 512  }
 0x1b2   : > { %615 = vsyncadd (!%p511_p2), %s418_s8, 4294966784  ;;  %p12_p3 = scmp.ge.s32.totalorder %s677_s15, 4   ;;  %s871_s9 = smov %s622_s10 }
 0x1b3   : > { %s872_s10 = smov %s626_s11  ;;  %s873_s11 = smov %s688_s18 }
 0x1b4   : > { %s874_s12 = smov %s677_s15  ;;  %14 = sbr.rel (!%p12_p3) target bundleno = 3 (0x3), region = 69 }
 0x1bb   :  { %423 = vsyncpa [#allocation3], 1 }
 0x1bc   :  { %425 = vsyncpa [#allocation3 + $0x1], 1 }

</bundles_post_ra>
